<compile_context>
chip_gen: v7x
topology: tpu7x:2x2x1
jax: 0.10.0
libtpu: 0.0.40
codegen_flags: <defaults>
</compile_context>

<pallas_src>
import math
import functools
import numpy as np
import jax
import jax.numpy as jnp
from jax.experimental import pallas as pl
from jax.experimental.pallas import tpu as pltpu

_PI = math.pi
_TAN_3PI_8 = 2.414213562373095    # tan(3*pi/8)
_TAN_PI_8 = 0.4142135623730951    # tan(pi/8)


# ---------------- in-kernel helpers (basic VPU ops + one divide) ----------------
def _atan2(y, x):
    """atan2(y, x) built from add/mul/cmp/select and ONE divide (Cephes atanf poly).
    Matches torch.angle to ~1e-6 rad.
    Note: returns +pi for (x<0, y=-0.0) where torch returns -pi (branch-cut sign only)."""
    ax = jnp.abs(x)
    ay = jnp.abs(y)
    big = ay > _TAN_3PI_8 * ax            # t = ay/ax > tan(3*pi/8)
    mid = ay > _TAN_PI_8 * ax             # t > tan(pi/8)
    # per-branch numerator/denominator so only ONE EUP divide is issued:
    #   big: -1/t = -ax/ay ; mid: (t-1)/(t+1) = (ay-ax)/(ay+ax) ; else: t = ay/ax
    num = jnp.where(big, -ax, jnp.where(mid, ay - ax, ay))
    den = jnp.where(big, ay, jnp.where(mid, ay + ax, ax))
    u = num / jnp.maximum(den, 1e-30)
    base = jnp.where(big, 0.5 * _PI, jnp.where(mid, 0.25 * _PI, 0.0))
    z = u * u
    poly = (((8.05374449538e-2 * z - 1.38776856032e-1) * z
             + 1.99777106478e-1) * z - 3.33329491539e-1)
    r = base + u + u * z * poly           # atan(ay/ax) in [0, pi/2]
    r = jnp.where(x < 0.0, _PI - r, r)    # quadrant fix-up
    return jnp.where(y < 0.0, -r, r)


# ---------------- the fused kernel ----------------
def _spectral_conv1d_kernel(x_ref, g_ref, out_ref):
    """x_ref: (TB, C_in*L) f32; g_ref: (C_in*L, 2*C_out*modes) bf16 folded operator.
    out_ref: (TB, 4*C_out*modes) f32 packed as [ |out| | angle(out) | Re(out) | Im(out) ]."""
    cm = g_ref.shape[1] // 2                               # C_out*modes (static)
    c = jnp.cos(x_ref[...]).astype(jnp.bfloat16)           # bf16 MXU operands, f32 accum
    ri = jnp.dot(c, g_ref[...], preferred_element_type=jnp.float32)   # (TB, 2*CM)
    ore = ri[:, :cm]
    oim = ri[:, cm:]
    # TODO(synk): plain sqrt(re^2+im^2); torch.abs on complex uses a scaled hypot — same
    # result at this weight scale but not overflow/underflow safe for extreme magnitudes.
    r = jnp.sqrt(ore * ore + oim * oim)
    p = _atan2(oim, ore)
    out_ref[...] = jnp.concatenate([r, p, ri], axis=-1)    # one wide lane-dense store


# ---------------- one-time (cached) operator fold: DFT basis + complex weights ----------------
def make_spectral_conv1d_operator(w_re, w_im, length):
    """Fold the truncated ortho-rfft and the complex mixing into ONE real matrix G so that
        [Re(out) | Im(out)] (b, o*modes + k)  =  cos(x).reshape(B, C_in*L) @ G
    G[i*L+n,        o*modes+k] = fre[n,k]*w_re[i,o,k] - fim[n,k]*w_im[i,o,k]
    G[i*L+n,  CM +  o*modes+k] = fre[n,k]*w_im[i,o,k] + fim[n,k]*w_re[i,o,k]
    with fre/fim the dense (L, modes) ortho DFT basis. Built once host-side (NumPy),
    returned as bf16 (native MXU operand type on all TPU generations)."""
    c_in, c_out, modes = w_re.shape
    n = np.arange(length)[:, None]
    k = np.arange(modes)[None, :]
    ang = (n * k % length).astype(np.float64) * (2.0 * np.pi / length)
    s = 1.0 / math.sqrt(float(length))
    fre = np.cos(ang) * s                  # Re e^{-2*pi*i*n*k/L} / sqrt(L)
    fim = -np.sin(ang) * s                 # Im
    wre = np.asarray(w_re, np.float64)
    wim = np.asarray(w_im, np.float64)
    g_re = np.einsum("nk,iok->inok", fre, wre) - np.einsum("nk,iok->inok", fim, wim)
    g_im = np.einsum("nk,iok->inok", fre, wim) + np.einsum("nk,iok->inok", fim, wre)
    cm = c_out * modes
    g = np.concatenate([g_re.reshape(c_in * length, cm),
                        g_im.reshape(c_in * length, cm)], axis=1)
    # Guard: the fully-folded operator must stay comfortably VMEM-resident (256 KiB here).
    # At large C_in*L*C_out*modes revert to a two-matmul (F, W2) form with a modes-tiled
    # grid that streams weight tiles instead of folding.
    assert g.size * 2 <= 8 * 1024 * 1024, "folded operator too large for VMEM residency"
    return jnp.asarray(g.astype(np.float32)).astype(jnp.bfloat16)


# ---------------- full forward ----------------
@functools.partial(jax.jit, static_argnames=("c_out", "modes"))
def spectral_conv1d_forward(x, g, *, c_out, modes):
    """x: (B, C_in, L) f32; g: folded operator from make_spectral_conv1d_operator.
    Returns (concat([|out|, angle(out)], -1), out_ft) exactly like SpectralConv1d.forward."""
    b, c_in, length = x.shape
    n_rfft = length // 2 + 1
    cm = c_out * modes
    x_flat = x.reshape(b, c_in * length).astype(jnp.float32)   # batch on sublanes

    # batch tile: full batch while tiny; 128-row tiles otherwise so the "parallel" grid
    # axis can spread blocks across v7x's two TensorCores.
    tb = b if b <= 128 else 128
    assert b % tb == 0

    packed = pl.pallas_call(
        _spectral_conv1d_kernel,
        out_shape=jax.ShapeDtypeStruct((b, 4 * cm), jnp.float32),
        grid_spec=pltpu.PrefetchScalarGridSpec(
            num_scalar_prefetch=0,
            grid=(b // tb,),
            in_specs=[pl.BlockSpec((tb, c_in * length), lambda i: (i, 0)),
                      pl.BlockSpec((c_in * length, 2 * cm), lambda i: (0, 0))],
            out_specs=pl.BlockSpec((tb, 4 * cm), lambda i: (i, 0))),
        compiler_params=pltpu.CompilerParams(dimension_semantics=("parallel",)),
    )(x_flat, g)

    r = packed[:, 0 * cm:1 * cm].reshape(b, c_out, modes)
    p = packed[:, 1 * cm:2 * cm].reshape(b, c_out, modes)
    ore = packed[:, 2 * cm:3 * cm].reshape(b, c_out, modes)
    oim = packed[:, 3 * cm:4 * cm].reshape(b, c_out, modes)

    rp = jnp.concatenate([r, p], axis=-1)                       # (B, C_out, 2*modes)
    # TODO(synk): Pallas TPU has no complex dtype; out_ft is assembled from the kernel's
    # real/imag lanes here (bins >= modes1 are structurally zero in the reference).
    out_modes = jax.lax.complex(ore, oim)
    out_ft = jnp.pad(out_modes, ((0, 0), (0, 0), (0, n_rfft - modes)))
    return rp, out_ft


if __name__ == "__main__":
    B, C_IN, C_OUT, MODES, FL = 2, 4, 8, 16, 128

    key = jax.random.PRNGKey(0)
    kx, kr, ki = jax.random.split(key, 3)
    x = jax.random.normal(kx, (B, C_IN, FL), jnp.float32)
    scale = 1.0 / (C_IN * C_OUT)                                # matches the module's self.scale
    w_re = scale * jax.random.uniform(kr, (C_IN, C_OUT, MODES), jnp.float32)
    w_im = scale * jax.random.uniform(ki, (C_IN, C_OUT, MODES), jnp.float32)

    # fold basis + weights ONCE (not per forward) — host-side constant, reused every call.
    g = make_spectral_conv1d_operator(w_re, w_im, FL)

    rp, out_ft = spectral_conv1d_forward(x, g, c_out=C_OUT, modes=MODES)
    rp, out_ft = jax.block_until_ready((rp, out_ft))

    assert rp.shape == (B, C_OUT, 2 * MODES), rp.shape
    assert out_ft.shape == (B, C_OUT, FL // 2 + 1) and out_ft.dtype == jnp.complex64
    assert bool(jnp.all(jnp.isfinite(rp)))

    # structural check against a pure-JAX reference (tolerance covers bf16 MXU operands)
    x_ft_ref = jnp.fft.rfft(jnp.cos(x), norm="ortho")[:, :, :MODES]
    out_ref = jnp.einsum("bix,iox->box", x_ft_ref, w_re + 1j * w_im)
    assert np.allclose(np.asarray(out_ft[:, :, :MODES]), np.asarray(out_ref),
                       rtol=5e-2, atol=5e-2)
    assert np.allclose(np.asarray(out_ft[:, :, MODES:]), 0.0)
    recon = rp[..., :MODES] * jnp.exp(1j * rp[..., MODES:])     # r * e^{i p}
    assert np.allclose(np.asarray(recon), np.asarray(out_ref), rtol=5e-2, atol=5e-2)

    print("KERNEL_OK")
</pallas_src>

<mosaic_0001>
module attributes {stable_mosaic.version = 11 : i64} {
  func.func @_spectral_conv1d_kernel(%arg0: i32, %arg1: memref<2x512xf32, #tpu.memory_space<vmem>>, %arg2: memref<512x256xbf16, #tpu.memory_space<vmem>>, %arg3: memref<2x512xf32, #tpu.memory_space<vmem>>) attributes {dimension_semantics = [#tpu.dimension_semantics<parallel>], iteration_bounds = array<i64: 1>, scalar_prefetch = 0 : i64, scratch_operands = 0 : i64, tpu.core_type = #tpu.core_type<tc>, window_params = [{transform_indices = @transform_0, window_bounds = array<i64: 2, 512>}, {pipeline_mode = #tpu.pipeline_mode<synchronous>, transform_indices = @transform_1, window_bounds = array<i64: 512, 256>}, {transform_indices = @transform_2, window_bounds = array<i64: 2, 512>}]} {
    %c0 = arith.constant 0 : index
    %c0_0 = arith.constant 0 : index
    %0 = vector.load %arg1[%c0, %c0_0] : memref<2x512xf32, #tpu.memory_space<vmem>>, vector<2x512xf32>
    %1 = math.cos %0 : vector<2x512xf32>
    %2 = arith.truncf %1 : vector<2x512xf32> to vector<2x512xbf16>
    %c0_1 = arith.constant 0 : index
    %c0_2 = arith.constant 0 : index
    %3 = vector.load %arg2[%c0_1, %c0_2] : memref<512x256xbf16, #tpu.memory_space<vmem>>, vector<512x256xbf16>
    %cst = arith.constant dense<0.000000e+00> : vector<2x256xf32>
    %4 = tpu.matmul %2, %3, %cst {dimension_numbers = #tpu.dot_dimension_numbers<[1], [0], [0], [1], [0, 0, 1, 1], [], []>} : vector<2x512xbf16>, vector<512x256xbf16>, vector<2x256xf32> -> vector<2x256xf32>
    %5 = vector.extract_strided_slice %4 {offsets = [0, 0], sizes = [2, 128], strides = [1, 1]} : vector<2x256xf32> to vector<2x128xf32>
    %6 = vector.extract_strided_slice %4 {offsets = [0, 128], sizes = [2, 128], strides = [1, 1]} : vector<2x256xf32> to vector<2x128xf32>
    %7 = arith.mulf %5, %5 : vector<2x128xf32>
    %8 = arith.mulf %6, %6 : vector<2x128xf32>
    %9 = arith.addf %7, %8 : vector<2x128xf32>
    %10 = math.sqrt %9 : vector<2x128xf32>
    %11 = math.absf %5 : vector<2x128xf32>
    %12 = math.absf %6 : vector<2x128xf32>
    %cst_3 = arith.constant 2.41421366 : f32
    %13 = vector.broadcast %cst_3 : f32 to vector<2x128xf32>
    %14 = arith.mulf %13, %11 : vector<2x128xf32>
    %15 = arith.cmpf ogt, %12, %14 : vector<2x128xf32>
    %cst_4 = arith.constant 0.414213568 : f32
    %16 = vector.broadcast %cst_4 : f32 to vector<2x128xf32>
    %17 = arith.mulf %16, %11 : vector<2x128xf32>
    %18 = arith.cmpf ogt, %12, %17 : vector<2x128xf32>
    %cst_5 = arith.constant 0.000000e+00 : f32
    %19 = vector.broadcast %cst_5 : f32 to vector<2x128xf32>
    %20 = arith.subf %19, %11 : vector<2x128xf32>
    %21 = arith.subf %12, %11 : vector<2x128xf32>
    %22 = arith.select %18, %21, %12 : vector<2x128xi1>, vector<2x128xf32>
    %23 = arith.select %15, %20, %22 : vector<2x128xi1>, vector<2x128xf32>
    %24 = arith.addf %12, %11 : vector<2x128xf32>
    %25 = arith.select %18, %24, %11 : vector<2x128xi1>, vector<2x128xf32>
    %26 = arith.select %15, %12, %25 : vector<2x128xi1>, vector<2x128xf32>
    %cst_6 = arith.constant 1.000000e-30 : f32
    %27 = vector.broadcast %cst_6 : f32 to vector<2x128xf32>
    %28 = arith.maximumf %26, %27 : vector<2x128xf32>
    %29 = arith.divf %23, %28 : vector<2x128xf32>
    %cst_7 = arith.constant 0.785398185 : f32
    %cst_8 = arith.constant 0.000000e+00 : f32
    %30 = vector.broadcast %cst_7 : f32 to vector<2x128xf32>
    %31 = vector.broadcast %cst_8 : f32 to vector<2x128xf32>
    %32 = arith.select %18, %30, %31 : vector<2x128xi1>, vector<2x128xf32>
    %cst_9 = arith.constant 1.57079637 : f32
    %33 = vector.broadcast %cst_9 : f32 to vector<2x128xf32>
    %34 = arith.select %15, %33, %32 : vector<2x128xi1>, vector<2x128xf32>
    %35 = arith.mulf %29, %29 : vector<2x128xf32>
    %cst_10 = arith.constant 0.0805374458 : f32
    %36 = vector.broadcast %cst_10 : f32 to vector<2x128xf32>
    %37 = arith.mulf %36, %35 : vector<2x128xf32>
    %cst_11 = arith.constant 0.138776854 : f32
    %38 = vector.broadcast %cst_11 : f32 to vector<2x128xf32>
    %39 = arith.subf %37, %38 : vector<2x128xf32>
    %40 = arith.mulf %39, %35 : vector<2x128xf32>
    %cst_12 = arith.constant 0.199777111 : f32
    %41 = vector.broadcast %cst_12 : f32 to vector<2x128xf32>
    %42 = arith.addf %40, %41 : vector<2x128xf32>
    %43 = arith.mulf %42, %35 : vector<2x128xf32>
    %cst_13 = arith.constant 0.333329499 : f32
    %44 = vector.broadcast %cst_13 : f32 to vector<2x128xf32>
    %45 = arith.subf %43, %44 : vector<2x128xf32>
    %46 = arith.addf %34, %29 : vector<2x128xf32>
    %47 = arith.mulf %29, %35 : vector<2x128xf32>
    %48 = arith.mulf %47, %45 : vector<2x128xf32>
    %49 = arith.addf %46, %48 : vector<2x128xf32>
    %cst_14 = arith.constant 0.000000e+00 : f32
    %50 = vector.broadcast %cst_14 : f32 to vector<2x128xf32>
    %51 = arith.cmpf olt, %5, %50 : vector<2x128xf32>
    %cst_15 = arith.constant 3.14159274 : f32
    %52 = vector.broadcast %cst_15 : f32 to vector<2x128xf32>
    %53 = arith.subf %52, %49 : vector<2x128xf32>
    %54 = arith.select %51, %53, %49 : vector<2x128xi1>, vector<2x128xf32>
    %cst_16 = arith.constant 0.000000e+00 : f32
    %55 = vector.broadcast %cst_16 : f32 to vector<2x128xf32>
    %56 = arith.cmpf olt, %6, %55 : vector<2x128xf32>
    %cst_17 = arith.constant 0.000000e+00 : f32
    %57 = vector.broadcast %cst_17 : f32 to vector<2x128xf32>
    %58 = arith.subf %57, %54 : vector<2x128xf32>
    %59 = arith.select %56, %58, %54 : vector<2x128xi1>, vector<2x128xf32>
    %60 = tpu.concatenate %10, %59, %4 in 1 : vector<2x128xf32>, vector<2x128xf32>, vector<2x256xf32> -> vector<2x512xf32>
    %c0_18 = arith.constant 0 : index
    %c0_19 = arith.constant 0 : index
    %61 = vector.load %arg3[%c0_18, %c0_19] : memref<2x512xf32, #tpu.memory_space<vmem>>, vector<2x512xf32>
    tpu.vector_store %arg3[%c0_18, %c0_19], %60 {strides = array<i32>} : memref<2x512xf32, #tpu.memory_space<vmem>>, vector<2x512xf32>,
    return
  }
  func.func @transform_0(%arg0: i32) -> (i32, i32) {
    %c0_i32 = arith.constant 0 : i32
    %c0_i32_0 = arith.constant 0 : i32
    return %arg0, %c0_i32 : i32, i32
  }
  func.func @transform_1(%arg0: i32) -> (i32, i32) {
    %c0_i32 = arith.constant 0 : i32
    %c0_i32_0 = arith.constant 0 : i32
    %c0_i32_1 = arith.constant 0 : i32
    return %c0_i32, %c0_i32_0 : i32, i32
  }
  func.func @transform_2(%arg0: i32) -> (i32, i32) {
    %c0_i32 = arith.constant 0 : i32
    %c0_i32_0 = arith.constant 0 : i32
    return %arg0, %c0_i32 : i32, i32
  }
}

</mosaic_0001>

<bundles_post_ra>
// kernel: custom-call
= control target key start
LH: loop header
LB: loop body
LE: loop exit
PB: predicated region body
PF: predicated region fallthrough
CT: control target
= control target key end

     0   :  { %s126_s0 = inlined_call_operand.vmem [shape: f32[2,8,65], index: 0, kind: input, shape index: {}]   ;;  %s127_s1 = inlined_call_operand.vmem [shape: f32[2,8,65], index: 1, kind: input, shape index: {}]   ;;  %s128_s2 = inlined_call_operand.hbm [shape: c64[2,8,65], index: 2, kind: output, shape index: {}]  }
   0x1   :  { %s87_s11 = scalar_lea.hbm %s128_s2, 256 }
   0x2   :  { %4 = vsyncpa [#allocation0], 0  ;;  %s5_s14 = sshll.u32 %s126_s0, 4  ;;  %s6_s14 = int_to_ptr.vmem [resolvable:$true] %s5_s14 }
   0x3   :  { %s18_s15 = scalar_lea.vmem %s6_s14, 256  ;;  %p23_p1 = scmp.lt.s32.totalorder %s6_s14, %s6_s14 }
   0x4   :  { %p19_p0 = scmp.ne.s32.totalorder %s6_s14, %s18_s15  ;;  %p24_p2 = scmp.lt.s32.totalorder %s18_s15, %s18_s15 }
   0x6   :  { %p25_p3 = por %p24_p2, %p23_p1 }
   0x8   :  { %p26_p4 = pnand %p25_p3, %p19_p0 }
   0xa   :  { %29 = shalt.err (!%p26_p4)  }
   0xb   :  { %p31_p5 = scmp.ne.s32.totalorder %s128_s2, %s87_s11  ;;  %s32_s0 = scalar_lea.hbm %s128_s2, 512 }
   0xc   :  { %p33_p6 = scmp.lt.u32.totalorder %s32_s0, %s87_s11  ;;  %p34_p7 = scmp.lt.u32.totalorder %s87_s11, %s128_s2 }
   0xe   :  { %p35_p8 = por %p34_p7, %p33_p6 }
  0x10   :  { %p36_p9 = pnand %p35_p8, %p31_p5 }
  0x12   :  { %39 = shalt.err (!%p36_p9)  }
  0x13   :  { %8 = dma.vmem_to_hbm [thread:$0]  %s6_s14, 256, %s128_s2, [#allocation0] }
  0x14   :  { %65 = dma.done.wait [#allocation0], 256  }
  0x15   :  { %66 = vsyncadd [#allocation0], 4294967040 }
  0x16   :  { %10 = vsyncpa [#allocation0], 1 }
  0x17   :  { %11 = vsyncpa [#allocation1], 0  ;;  %s12_s28 = sshll.u32 %s127_s1, 4  ;;  %s13_s28 = int_to_ptr.vmem [resolvable:$true] %s12_s28 }
  0x18   :  { %s40_s29 = scalar_lea.vmem %s13_s28, 256  ;;  %p45_p11 = scmp.lt.s32.totalorder %s13_s28, %s13_s28 }
  0x19   :  { %p41_p10 = scmp.ne.s32.totalorder %s13_s28, %s40_s29  ;;  %p46_p12 = scmp.lt.s32.totalorder %s40_s29, %s40_s29 }
  0x1b   :  { %p47_p13 = por %p46_p12, %p45_p11 }
  0x1d   :  { %p48_p0 = pnand %p47_p13, %p41_p10 }
  0x1f   :  { %51 = shalt.err (!%p48_p0)  }
  0x20   :  { %p53_p1 = scmp.ne.s32.totalorder %s87_s11, %s32_s0  ;;  %p56_p2 = scmp.lt.u32.totalorder %s32_s0, %s32_s0 }
  0x22   :  { %p57_p3 = por %p56_p2, %p34_p7 }
  0x24   :  { %p59_p4 = por %p57_p3, %p33_p6 }
  0x26   :  { %p60_p5 = pnand %p59_p4, %p53_p1 }
  0x28   :  { %63 = shalt.err (!%p60_p5)  }
  0x29   :  { %15 = dma.vmem_to_hbm [thread:$0]  %s13_s28, 256, %s87_s11, [#allocation1] }
  0x2a   :  { %67 = dma.done.wait [#allocation1], 256  }
  0x2b   :  { %68 = vsyncadd [#allocation1], 4294967040 }
  0x2c   :  { %17 = vsyncpa [#allocation1], 1 }

// kernel: spectral_conv1d_forward.1
= control target key start
LH: loop header
LB: loop body
LE: loop exit
PB: predicated region body
PF: predicated region fallthrough
CT: control target
= control target key end

     0   :  { %7 = vsyncpa [#allocation3], 0  ;;  %s909_s9 = smov [#allocation2]   ;;  %s986_s0 = inlined_call_operand.vmem [shape: f32[2,512], index: 0, kind: input, shape index: {}]   ;;  %s987_s1 = inlined_call_operand.hbm [shape: bf16[512,256], index: 1, kind: input, shape index: {}]   ;;  %s988_s2 = inlined_call_operand.vmem [shape: f32[2,512], index: 2, kind: output, shape index: {}]  }
   0x1   :  { %s15_s10 = sshll.u32 %s909_s9, 4  ;;  %s885_s13 = scalar_lea.hbm %s987_s1, 8192  ;;  %s16_s10 = int_to_ptr.vmem [resolvable:$true] %s15_s10 }
   0x2   :  { %p886_p0 = scmp.ne.s32.totalorder %s987_s1, %s885_s13  ;;  %p889_p1 = scmp.lt.u32.totalorder %s885_s13, %s987_s1 }
   0x4   :  { %p891_p2 = pnand %p889_p1, %p886_p0 }
   0x6   :  { %894 = shalt.err (!%p891_p2)
}
   0x7   :  { %s895_s18 = scalar_lea.vmem %s16_s10, 8192  ;;  %p900_p4 = scmp.lt.s32.totalorder %s16_s10, %s16_s10 }
   0x8   :  { %p896_p3 = scmp.ne.s32.totalorder %s16_s10, %s895_s18  ;;  %p901_p5 = scmp.lt.s32.totalorder %s895_s18, %s895_s18 }
   0xa   :  { %p902_p6 = por %p901_p5, %p900_p4 }
   0xc   :  { %p903_p7 = pnand %p902_p6, %p896_p3 }
   0xe   :  { %906 = shalt.err (!%p903_p7)
}
   0xf   :  { %s910_s19 = smov 128   ;;  %s911_s20 = smov 8  }
  0x10   :  { %21 = dma.hbm_to_vmem [thread:$0]  %s987_s1, 8192, %s16_s10, [#allocation3], %s910_s19, %s910_s19, %s911_s20  }
  0x11   :  { %907 = dma.done.wait [#allocation3], 8192  }
  0x12   :  { %908 = vsyncadd [#allocation3], 4294959104  ;;  %v781_v0 = vld [vmem:[#allocation2 + $0x4] ss:$8 sps:$4 sm:$0xff]   ;;  %v783_v1 = vld [vmem:[#allocation2] ss:$8 sps:$4 sm:$0xff]  }
  0x13   :  { %539 = vmatprep.subr.bf16.mxu1 %v781_v0  ;;  %v784_v2 = vld [vmem:[#allocation2 + $0x104] ss:$8 sps:$4 sm:$0xff]   ;;  %v786_v3 = vld [vmem:[#allocation2 + $0x100] ss:$8 sps:$4 sm:$0xff]   ;;  %v787_v4 = vld [vmem:[#allocation2 + $0x14] ss:$8 sps:$4 sm:$0xff]  }
  0x14   :  { %540 = vmatpush1.bf16.msra.mxu1 %v783_v1  ;;  %v789_v5 = vld [vmem:[#allocation2 + $0x10] ss:$8 sps:$4 sm:$0xff]   ;;  %580 = vmatprep.subr.bf16.mxu0 %v784_v2  ;;  %v790_v6 = vld [vmem:[#allocation2 + $0x114] ss:$8 sps:$4 sm:$0xff]   ;;  %v793_v8 = vld [vmem:[#allocation2 + $0x24] ss:$8 sps:$4 sm:$0xff]  }
  0x15   :  { %581 = vmatpush1.bf16.msra.mxu0 %v786_v3  ;;  %541 = vmatprep.subr.bf16.mxu1 %v787_v4  ;;  %v792_v7 = vld [vmem:[#allocation2 + $0x110] ss:$8 sps:$4 sm:$0xff]   ;;  %v795_v9 = vld [vmem:[#allocation2 + $0x20] ss:$8 sps:$4 sm:$0xff]   ;;  %v796_v10 = vld [vmem:[#allocation2 + $0x124] ss:$8 sps:$4 sm:$0xff]  }
  0x16   :  { %582 = vmatprep.subr.bf16.mxu0 %v790_v6  ;;  %v799_v11 = vld [vmem:[#allocation2 + $0x34] ss:$8 sps:$4 sm:$0xff]   ;;  %v798_v12 = vld [vmem:[#allocation2 + $0x120] ss:$8 sps:$4 sm:$0xff]   ;;  %v801_v14 = vld [vmem:[#allocation2 + $0x30] ss:$8 sps:$4 sm:$0xff]  }
  0x17   :  { %v802_v13 = vld [vmem:[#allocation2 + $0x134] ss:$8 sps:$4 sm:$0xff]   ;;  %v805_v15 = vld [vmem:[#allocation2 + $0x44] ss:$8 sps:$4 sm:$0xff]   ;;  %v804_v16 = vld [vmem:[#allocation2 + $0x130] ss:$8 sps:$4 sm:$0xff]  }
  0x18   :  { %542 = vmatpush1.bf16.msra.mxu1 %v789_v5  ;;  %v808_v17 = vld [vmem:[#allocation2 + $0x144] ss:$8 sps:$4 sm:$0xff]   ;;  %v807_v18 = vld [vmem:[#allocation2 + $0x40] ss:$8 sps:$4 sm:$0xff]   ;;  %v811_v19 = vld [vmem:[#allocation2 + $0x54] ss:$8 sps:$4 sm:$0xff]  }
  0x19   :  { %543 = vmatprep.subr.bf16.mxu1 %v793_v8  ;;  %583 = vmatpush1.bf16.msra.mxu0 %v792_v7  ;;  %v810_v20 = vld [vmem:[#allocation2 + $0x140] ss:$8 sps:$4 sm:$0xff]   ;;  %v814_v21 = vld [vmem:[#allocation2 + $0x154] ss:$8 sps:$4 sm:$0xff]   ;;  %v813_v22 = vld [vmem:[#allocation2 + $0x50] ss:$8 sps:$4 sm:$0xff]  }
  0x1a   :  { %584 = vmatprep.subr.bf16.mxu0 %v796_v10  ;;  %v817_v23 = vld [vmem:[#allocation2 + $0x64] ss:$8 sps:$4 sm:$0xff]   ;;  %v816_v24 = vld [vmem:[#allocation2 + $0x150] ss:$8 sps:$4 sm:$0xff]   ;;  %v819_v26 = vld [vmem:[#allocation2 + $0x60] ss:$8 sps:$4 sm:$0xff]  }
  0x1b   :  { %v820_v25 = vld [vmem:[#allocation2 + $0x164] ss:$8 sps:$4 sm:$0xff]   ;;  %v823_v27 = vld [vmem:[#allocation2 + $0x74] ss:$8 sps:$4 sm:$0xff]   ;;  %v822_v28 = vld [vmem:[#allocation2 + $0x160] ss:$8 sps:$4 sm:$0xff]  }
  0x1c   :  { %544 = vmatpush1.bf16.msra.mxu1 %v795_v9  ;;  %v826_v29 = vld [vmem:[#allocation2 + $0x174] ss:$8 sps:$4 sm:$0xff]   ;;  %v825_v30 = vld [vmem:[#allocation2 + $0x70] ss:$8 sps:$4 sm:$0xff]   ;;  %v829_v31 = vld [vmem:[#allocation2 + $0x84] ss:$8 sps:$4 sm:$0xff]  }
  0x1d   :  { %545 = vmatprep.subr.bf16.mxu1 %v799_v11  ;;  %585 = vmatpush1.bf16.msra.mxu0 %v798_v12  ;;  %v828_v32 = vld [vmem:[#allocation2 + $0x170] ss:$8 sps:$4 sm:$0xff]   ;;  %v832_v33 = vld [vmem:[#allocation2 + $0x184] ss:$8 sps:$4 sm:$0xff]   ;;  %v831_v34 = vld [vmem:[#allocation2 + $0x80] ss:$8 sps:$4 sm:$0xff]  }
  0x1e   :  { %586 = vmatprep.subr.bf16.mxu0 %v802_v13  ;;  %v835_v35 = vld [vmem:[#allocation2 + $0x94] ss:$8 sps:$4 sm:$0xff]   ;;  %v834_v36 = vld [vmem:[#allocation2 + $0x180] ss:$8 sps:$4 sm:$0xff]   ;;  %v837_v38 = vld [vmem:[#allocation2 + $0x90] ss:$8 sps:$4 sm:$0xff]  }
  0x1f   :  { %v838_v37 = vld [vmem:[#allocation2 + $0x194] ss:$8 sps:$4 sm:$0xff]   ;;  %v841_v39 = vld [vmem:[#allocation2 + $0xa4] ss:$8 sps:$4 sm:$0xff]   ;;  %v840_v40 = vld [vmem:[#allocation2 + $0x190] ss:$8 sps:$4 sm:$0xff]  }
  0x20   :  { %546 = vmatpush1.bf16.msra.mxu1 %v801_v14  ;;  %v844_v41 = vld [vmem:[#allocation2 + $0x1a4] ss:$8 sps:$4 sm:$0xff]   ;;  %v843_v42 = vld [vmem:[#allocation2 + $0xa0] ss:$8 sps:$4 sm:$0xff]   ;;  %v847_v43 = vld [vmem:[#allocation2 + $0xb4] ss:$8 sps:$4 sm:$0xff]  }
  0x21   :  { %547 = vmatprep.subr.bf16.mxu1 %v805_v15  ;;  %587 = vmatpush1.bf16.msra.mxu0 %v804_v16  ;;  %v846_v44 = vld [vmem:[#allocation2 + $0x1a0] ss:$8 sps:$4 sm:$0xff]   ;;  %v850_v45 = vld [vmem:[#allocation2 + $0x1b4] ss:$8 sps:$4 sm:$0xff]   ;;  %v849_v47 = vld [vmem:[#allocation2 + $0xb0] ss:$8 sps:$4 sm:$0xff]  }
  0x22   :  { %588 = vmatprep.subr.bf16.mxu0 %v808_v17  ;;  %v950_v46 = vld [vmem:[%s986_s0] sm:$0xff]  ;;  %v852_v50 = vld [vmem:[#allocation2 + $0x1b0] ss:$8 sps:$4 sm:$0xff]   ;;  %v859_v56 = vld [vmem:[#allocation2 + $0xd4] ss:$8 sps:$4 sm:$0xff]  }
  0x23   :  { %v29_v48 = vand.u32 2139095040, %v950_v46  ;;  %v853_v49 = vld [vmem:[#allocation2 + $0xc4] ss:$8 sps:$4 sm:$0xff]   ;;  %v26_v53 = vand.u32 2147483647, %v950_v46  ;;  %vm28_vm7 = vcmp.lt.s32.totalorder %v950_v46, 0  ;;  %vm118_vm12 = vweird.f32 %v950_v46 }
  0x24   :  { %548 = vmatpush1.bf16.msra.mxu1 %v807_v18  ;;  %v856_v52 = vld [vmem:[#allocation2 + $0x1c4] ss:$8 sps:$4 sm:$0xff]   ;;  %v855_v54 = vld [vmem:[#allocation2 + $0xc0] ss:$8 sps:$4 sm:$0xff]   ;;  %v862_v59 = vld [vmem:[#allocation2 + $0x1d4] ss:$8 sps:$4 sm:$0xff]  }
  0x25   :  { %549 = vmatprep.subr.bf16.mxu1 %v811_v19  ;;  %589 = vmatpush1.bf16.msra.mxu0 %v810_v20  ;;  %v30_v51 = vshrl.u32 %v29_v48, 23  ;;  %v858_v57 = vld [vmem:[#allocation2 + $0x1c0] ss:$8 sps:$4 sm:$0xff]   ;;  %v33_v60 = vand.u32 8388607, %v26_v53 }
  0x26   :  { %590 = vmatprep.subr.bf16.mxu0 %v814_v21  ;;  %v861_v61 = vld [vmem:[#allocation2 + $0xd0] ss:$8 sps:$4 sm:$0xff]   ;;  %v865_v62 = vld [vmem:[#allocation2 + $0xe4] ss:$8 sps:$4 sm:$0xff]   ;;  %v867_v5 = vld [vmem:[#allocation2 + $0xe0] ss:$8 sps:$4 sm:$0xff]  }
  0x27   :  { %v694_v55 = vadd.s32 4294967169, %v30_v51  ;;  %v864_v0 = vld [vmem:[#allocation2 + $0x1d0] ss:$8 sps:$4 sm:$0xff]   ;;  %v868_v2 = vld [vmem:[#allocation2 + $0x1e4] ss:$8 sps:$4 sm:$0xff]   ;;  %v34_v3 = vor.u32 8388608, %v33_v60 }
  0x28   :  { %550 = vmatpush1.bf16.msra.mxu1 %v813_v22  ;;  %v912_v7 = vmov 683565275   ;;  %v913_v9 = vmov 2475754826   ;;  %v914_v11 = vmov 2131351028  }
  0x29   :  { %551 = vmatprep.subr.bf16.mxu1 %v817_v23  ;;  %591 = vmatpush1.bf16.msra.mxu0 %v816_v24  ;;  %v36_v58 = vadd.s32 1, %v694_v55  ;;  %v871_v13 = vld [vmem:[#allocation2 + $0xf4] ss:$8 sps:$4 sm:$0xff]   ;;  %v915_v14 = vmov 2102212464  }
  0x2a   :  { %592 = vmatprep.subr.bf16.mxu0 %v820_v25  ;;  %v916_v16 = vmov 920167782   ;;  %v870_v18 = vld [vmem:[#allocation2 + $0x1e0] ss:$8 sps:$4 sm:$0xff]   ;;  %v874_v23 = vld [vmem:[#allocation2 + $0x1f4] ss:$8 sps:$4 sm:$0xff]  }
  0x2b   :  { %vm37_vm0 = vcmp.gt.s32.totalorder %v36_v58, 0  ;;  %v917_v25 = vmov 1326507024   ;;  %vm27_vm8 = vcmp.le.f32.partialorder %v26_v53, 0.7853982 }
  0x2c   :  { %552 = vmatpush1.bf16.msra.mxu1 %v819_v26  ;;  %v38_v63 = vsel %vm37_vm0, %v36_v58, 0 }
  0x2d   :  { %553 = vmatprep.subr.bf16.mxu1 %v823_v27  ;;  %593 = vmatpush1.bf16.msra.mxu0 %v822_v28  ;;  %v40_v1 = vand.u32 31, %v38_v63  ;;  %v39_v4 = vshrl.u32 %v38_v63, 5  ;;  %v74_v27 = vshll.u32 %v34_v3, 8  ;;  %v873_v28 = vld [vmem:[#allocation2 + $0xf0] ss:$8 sps:$4 sm:$0xff]  }
  0x2e   :  { %594 = vmatprep.subr.bf16.mxu0 %v826_v29 }
  0x2f   :  { %v41_v6 = vsub.s32 32, %v40_v1  ;;  %v43_v8 = vshll.u32 %v912_v7, %v40_v1  ;;  %v46_v10 = vshll.u32 %v913_v9, %v40_v1  ;;  %v49_v12 = vshll.u32 %v914_v11, %v40_v1 }
  0x30   :  { %554 = vmatpush1.bf16.msra.mxu1 %v825_v30  ;;  %v52_v15 = vshll.u32 %v915_v14, %v40_v1  ;;  %v55_v17 = vshll.u32 %v916_v16, %v40_v1  ;;  %vm58_vm1 = vcmp.lt.s32.totalorder %v39_v4, 1  ;;  %vm61_vm2 = vcmp.lt.s32.totalorder %v39_v4, 4 }
  0x31   :  { %555 = vmatprep.subr.bf16.mxu1 %v829_v31  ;;  %595 = vmatpush1.bf16.msra.mxu0 %v828_v32  ;;  %v42_v19 = vshrl.u32 %v912_v7, %v41_v6  ;;  %v44_v20 = vshrl.u32 %v913_v9, %v41_v6  ;;  %v47_v21 = vshrl.u32 %v914_v11, %v41_v6  ;;  %vm59_vm3 = vcmp.lt.s32.totalorder %v39_v4, 2 }
  0x32   :  { %596 = vmatprep.subr.bf16.mxu0 %v832_v33  ;;  %v50_v22 = vshrl.u32 %v915_v14, %v41_v6  ;;  %v53_v24 = vshrl.u32 %v916_v16, %v41_v6  ;;  %v56_v26 = vshrl.u32 %v917_v25, %v41_v6  ;;  %vm60_vm4 = vcmp.lt.s32.totalorder %v39_v4, 3 }
  0x33   :  { %v45_v29 = vor.u32 %v44_v20, %v43_v8  ;;  %v48_v30 = vor.u32 %v47_v21, %v46_v10  ;;  %v918_v20 = vmov 1983009808  }
  0x34   :  { %556 = vmatpush1.bf16.msra.mxu1 %v831_v34  ;;  %v51_v31 = vor.u32 %v50_v22, %v49_v12  ;;  %v54_v32 = vor.u32 %v53_v24, %v52_v15  ;;  %v57_v33 = vor.u32 %v56_v26, %v55_v17  ;;  %v132_v21 = vunpack.c.l.s4 %v918_v20 }
  0x35   :  { %557 = vmatprep.subr.bf16.mxu1 %v835_v35  ;;  %597 = vmatpush1.bf16.msra.mxu0 %v834_v36  ;;  %v62_v34 = vsel %vm58_vm1, %v42_v19, %v45_v29  ;;  %v66_v36 = vsel %vm58_vm1, %v45_v29, %v48_v30  ;;  %v134_v22 = vlaneseq }
  0x36   :  { %598 = vmatprep.subr.bf16.mxu0 %v838_v37  ;;  %v63_v35 = vsel %vm61_vm2, %v51_v31, 2102212464  ;;  %v70_v37 = vsel %vm58_vm1, %v48_v30, %v51_v31  ;;  %v133_v24 = vunpack.c.0.s8 %v132_v21 }
  0x37   :  { %v135_v25 = vshrl.u32 %v134_v22, 7 }
  0x38   :  { %558 = vmatpush1.bf16.msra.mxu1 %v837_v38  ;;  %v876_v38 = vld [vmem:[#allocation2 + $0x1f0] ss:$8 sps:$4 sm:$0xff]  }
  0x39   :  { %559 = vmatprep.subr.bf16.mxu1 %v841_v39  ;;  %599 = vmatpush1.bf16.msra.mxu0 %v840_v40  ;;  %v64_v39 = vsel %vm60_vm4, %v48_v30, %v63_v35  ;;  %v67_v40 = vsel %vm61_vm2, %v54_v32, 920167782  ;;  %v977_v30 = vsub.s32 %v133_v24, %v135_v25 }
  0x3a   :  { %600 = vmatprep.subr.bf16.mxu0 %v844_v41  ;;  %v71_v41 = vsel %vm61_vm2, %v57_v33, 1326507024 }
  0x3c   :  { %560 = vmatpush1.bf16.msra.mxu1 %v843_v42  ;;  %v68_v42 = vsel %vm60_vm4, %v51_v31, %v67_v40 }
  0x3d   :  { %561 = vmatprep.subr.bf16.mxu1 %v847_v43  ;;  %601 = vmatpush1.bf16.msra.mxu0 %v846_v44  ;;  %v72_v43 = vsel %vm60_vm4, %v54_v32, %v71_v41  ;;  %v65_v44 = vsel %vm59_vm3, %v62_v34, %v64_v39 }
  0x3e   :  { %602 = vmatprep.subr.bf16.mxu0 %v850_v45  ;;  %v69_v45 = vsel %vm59_vm3, %v66_v36, %v68_v42 }
  0x40   :  { %562 = vmatpush1.bf16.msra.mxu1 %v849_v47  ;;  %v73_v47 = vsel %vm59_vm3, %v70_v37, %v72_v43 }
  0x41   :  { %563 = vmatprep.subr.bf16.mxu1 %v853_v49  ;;  %603 = vmatpush1.bf16.msra.mxu0 %v852_v50  ;;  %v962_v48 = vmul.u32.u64.low %v74_v27, %v73_v47  ;;  %v963_v49 = vmul.u32.u64.high %v74_v27, %v73_v47, %v962_v48  ;;  %v965_v50 = vmul.u32.u64.low %v74_v27, %v69_v45  ;;  %v966_v51 = vmul.u32.u64.high %v74_v27, %v69_v45, %v965_v50 }
  0x42   :  { %604 = vmatprep.subr.bf16.mxu0 %v856_v52  ;;  %v81_v52 = vmul.u32 %v74_v27, %v65_v44 }
  0x43   :  { %vm83_vm5 = vc.u32 %v963_v49, %v965_v50  ;;  %v82_v1 = vadd.s32 %v965_v50, %v963_v49 }
  0x44   :  { %564 = vmatpush1.bf16.msra.mxu1 %v855_v54  ;;  %v84_v54 = vadd.s32 1, %v966_v51 }
  0x45   :  { %565 = vmatprep.subr.bf16.mxu1 %v859_v56  ;;  %605 = vmatpush1.bf16.msra.mxu0 %v858_v57 }
  0x46   :  { %606 = vmatprep.subr.bf16.mxu0 %v862_v59  ;;  %v85_v55 = vsel %vm83_vm5, %v84_v54, %v966_v51 }
  0x47   :  { %v86_v56 = vadd.s32 %v85_v55, %v81_v52 }
  0x48   :  { %566 = vmatpush1.bf16.msra.mxu1 %v861_v61 }
  0x49   :  { %567 = vmatprep.subr.bf16.mxu1 %v865_v62  ;;  %607 = vmatpush1.bf16.msra.mxu0 %v864_v0  ;;  %v87_v57 = vadd.s32 536870912, %v86_v56 }
  0x4a   :  { %608 = vmatprep.subr.bf16.mxu0 %v868_v2 }
  0x4b   :  { %v88_v58 = vshrl.u32 %v87_v57, 30 }
  0x4c   :  { %568 = vmatpush1.bf16.msra.mxu1 %v867_v5 }
  0x4d   :  { %569 = vmatprep.subr.bf16.mxu1 %v871_v13  ;;  %609 = vmatpush1.bf16.msra.mxu0 %v870_v18  ;;  %v89_v59 = vshll.u32 %v88_v58, 30  ;;  %v112_v15 = vsub.s32 4, %v88_v58 }
  0x4e   :  { %610 = vmatprep.subr.bf16.mxu0 %v874_v23 }
  0x4f   :  { %v90_v60 = vsub.s32 %v86_v56, %v89_v59  ;;  %v113_v18 = vsel %vm28_vm7, %v112_v15, %v88_v58 }
  0x50   :  { %570 = vmatpush1.bf16.msra.mxu1 %v873_v28  ;;  %v115_v19 = vsel %vm27_vm8, 0, %v113_v18 }
  0x51   :  { %611 = vmatpush1.bf16.msra.mxu0 %v876_v38  ;;  %v92_v61 = vsub.s32 0, %v90_v60  ;;  %v119_v23 = vand.u32 3, %v115_v19 }
  0x53   :  { %v695_v62 = vmin.u32 %v92_v61, %v90_v60  ;;  %vm124_vm9 = vcmp.eq.s32.totalorder %v119_v23, 2  ;;  %vm121_vm10 = vcmp.eq.s32.totalorder %v119_v23, 0  ;;  %vm120_vm11 = vcmp.lt.s32.totalorder %v119_v23, 2 }
  0x55   :  { %v94_v63 = vclz %v695_v62 }
  0x57   :  { %v696_v0 = vadd.s32 4294967294, %v94_v63 }
  0x59   :  { %vm697_vm6 = vcmp.lt.s32.totalorder %v696_v0, 0 }
  0x5a   :  { %v97_v2 = vsel %vm697_vm6, 0, %v696_v0 }
  0x5b   :  { %v98_v3 = vsub.s32 32, %v97_v2  ;;  %v99_v4 = vshll.u32 %v90_v60, %v97_v2  ;;  %v102_v5 = vsub.s32 4294967266, %v97_v2 }
  0x5d   :  { %v100_v6 = vshrl.u32 %v82_v1, %v98_v3  ;;  %v103_v7 = vadd.s32 127, %v102_v5  ;;  %v919_v3 = vmov 0.0  }
  0x5f   :  { %v101_v8 = vor.u32 %v100_v6, %v99_v4  ;;  %v104_v9 = vshll.u32 %v103_v7, 23 }
  0x61   :  { %v105_v10 = vor.u32 4788187, %v104_v9  ;;  %v108_v11 = vcvt.s32.f32 %v101_v8 }
  0x63   :  { %v106_v12 = vand.u32 2147483647, %v105_v10 }
  0x65   :  { %v109_v13 = vmul.f32 %v108_v11, %v106_v12 }
  0x67   :  { %v110_v14 = vxor.u32 2147483648, %v109_v13 }
  0x69   :  { %v111_v16 = vsel %vm28_vm7, %v110_v14, %v109_v13 }
  0x6a   :  { %v114_v17 = vsel %vm27_vm8, %v950_v46, %v111_v16 }
  0x6b   :  { %877 = vcosq.f32 %v114_v17 }
  0x6c   :  { %879 = vsinq.f32 %v114_v17 }
  0x75   :  { %v878_v26 = vpop.eup %877 }
  0x76   :  { %v880_v27 = vpop.eup %879  ;;  %v125_v53 = vxor.u32 2147483648, %v878_v26 }
  0x77   :  { %v122_v28 = vxor.u32 2147483648, %v880_v27 }
  0x78   :  { %v126_v29 = vsel %vm124_vm9, %v125_v53, %v880_v27 }
  0x79   :  { %v123_v31 = vsel %vm121_vm10, %v878_v26, %v122_v28 }
  0x7a   :  { %v127_v32 = vsel %vm120_vm11, %v123_v31, %v126_v29 }
  0x7b   :  { %v128_v33 = vsel %vm118_vm12, nan, %v127_v32 }
  0x7c   :  { %v137_v34 = vrot.slane %v128_v33, %v977_v30  ;;  %v130_v35 = vcombine.high %v128_v33, %v128_v33 }
  0x7e   :  { %v145_v36 = vcombine.high %v137_v34, %v137_v34  ;;  %v144_v37 = vrot.slane %v130_v35, %v977_v30  ;;  %v151_v38 = vpack.c.bf16 %v137_v34, %v137_v34 }
  0x80   :  { %v152_v39 = vpack.c.bf16 %v145_v36, %v145_v36  ;;  %v146_v40 = vcombine.high %v144_v37, %v144_v37  ;;  %v153_v41 = vpack.c.bf16 %v144_v37, %v144_v37 }
  0x82   :  { %571 = vmatprep.mubr.bf16.mxu1 %v152_v39  ;;  %v154_v42 = vpack.c.bf16 %v146_v40, %v146_v40 }
  0x83   :  { %572 = vmatmul.mubr.bf16.vlgmr.msra.gmra.mrb[0].mxu1 %v151_v38 }
  0x84   :  { %612 = vmatprep.mubr.bf16.mxu0 %v154_v42 }
  0x85   :  { %613 = vmatmul.mubr.bf16.vlgmr.msra.gmra.mrb[0].mxu0 %v153_v41 }
 0x156   :  { %v573_v46 = vpop.f32.mrb[0].mxu1 }
 0x157   :  { %v575_v43 = vpop.f32.mrb[1].mxu1 }
 0x158   :  { %v577_v44 = vpop.f32.mrb[2].mxu1  ;;  %v614_v45 = vpop.f32.mrb[0].mxu0 }
 0x159   :  { %v615_v47 = vadd.f32 %v614_v45, %v573_v46  ;;  %v578_v48 = vpop.f32.mrb[3].mxu1  ;;  %v616_v49 = vpop.f32.mrb[1].mxu0 }
 0x15a   :  { %v617_v50 = vadd.f32 %v616_v49, %v575_v43  ;;  %v618_v51 = vpop.f32.mrb[2].mxu0 }
 0x15b   :  { %v621_v52 = vmul.f32 %v615_v47, %v615_v47  ;;  %v631_v54 = vand.u32 2147483647, %v615_v47  ;;  %v619_v55 = vpop.f32.mrb[3].mxu0  ;;  %vm660_vm15 = vcmp.lt.f32.partialorder %v615_v47, 0.0 }
 0x15c   :  { %v622_v56 = vmul.f32 %v617_v50, %v617_v50  ;;  %v632_v57 = vand.u32 2147483647, %v617_v50  ;;  %v671_v58 = vcombine.low %v615_v47, %v617_v50  ;;  %vm663_vm2 = vcmp.lt.f32.partialorder %v617_v50, 0.0 }
 0x15d   :  { %v633_v59 = vmul.f32 2.4142137, %v631_v54  ;;  %v635_v60 = vmul.f32 0.41421357, %v631_v54  ;;  %v637_v0 = vsub.f32 0.0, %v631_v54 }
 0x15e   :  { %v623_v61 = vadd.f32 %v622_v56, %v621_v52  ;;  %v638_v62 = vsub.f32 %v632_v57, %v631_v54  ;;  %v641_v63 = vadd.f32 %v632_v57, %v631_v54  ;;  %v685_v33 = vrot.slane %v671_v58, %v977_v30 }
 0x15f   :  { %vm634_vm13 = vcmp.gt.f32.partialorder %v632_v57, %v633_v59  ;;  %vm636_vm14 = vcmp.gt.f32.partialorder %v632_v57, %v635_v60 }
 0x160   :  { %v639_v1 = vsel %vm636_vm14, %v638_v62, %v632_v57  ;;  %v642_v2 = vsel %vm636_vm14, %v641_v63, %v631_v54  ;;  %v647_v4 = vsel %vm636_vm14, 0.7853982, %v919_v3  ;;  %vm626_vm0 = vcmp.eq.f32.partialorder %v623_v61, inf }
 0x161   :  { %v640_v5 = vsel %vm634_vm13, %v637_v0, %v639_v1  ;;  %v643_v6 = vsel %vm634_vm13, %v632_v57, %v642_v2  ;;  %v648_v7 = vsel %vm634_vm13, 1.5707964, %v647_v4  ;;  %v629_v27 = vand.u32 2147483648, %v623_v61 }
 0x162   :  { %v644_v8 = vmax.f32 %v643_v6, 1e-30  ;;  %vm628_vm1 = vcmp.eq.f32.partialorder %v623_v61, 0.0 }
 0x164   :  { %881 = vrcp.f32 %v644_v8 }
 0x165   :  { %883 = vrsqrt.f32 %v623_v61 }
 0x16e   :  { %v882_v9 = vpop.eup %881 }
 0x16f   :  { %v646_v10 = vmul.f32 %v882_v9, %v640_v5  ;;  %v884_v20 = vpop.eup %883 }
 0x170   :  { %v625_v22 = vmul.f32 %v884_v20, %v623_v61 }
 0x171   :  { %v649_v11 = vmul.f32 %v646_v10, %v646_v10  ;;  %v656_v12 = vadd.f32 %v648_v7, %v646_v10 }
 0x172   :  { %v627_v25 = vsel %vm626_vm0, %v623_v61, %v625_v22 }
 0x173   :  { %v650_v13 = vmul.f32 0.080537446, %v649_v11  ;;  %v657_v19 = vmul.f32 %v649_v11, %v646_v10  ;;  %v630_v28 = vsel %vm628_vm1, %v629_v27, %v627_v25 }
 0x175   :  { %v762_v14 = vadd.f32 -0.13877685, %v650_v13 }
 0x177   :  { %v652_v15 = vmul.f32 %v762_v14, %v649_v11 }
 0x179   :  { %v653_v16 = vadd.f32 0.19977711, %v652_v15 }
 0x17b   :  { %v654_v17 = vmul.f32 %v653_v16, %v649_v11 }
 0x17d   :  { %v763_v18 = vadd.f32 -0.3333295, %v654_v17 }
 0x17f   :  { %v658_v21 = vmul.f32 %v763_v18, %v657_v19 }
 0x181   :  { %v659_v23 = vadd.f32 %v658_v21, %v656_v12 }
 0x183   :  { %v661_v24 = vsub.f32 3.1415927, %v659_v23 }
 0x185   :  { %v662_v26 = vsel %vm660_vm15, %v661_v24, %v659_v23 }
 0x186   :  { %v664_v53 = vsub.f32 0.0, %v662_v26 }
 0x188   :  { %v665_v29 = vsel %vm663_vm2, %v664_v53, %v662_v26 }
 0x189   :  { %v670_v31 = vcombine.low %v630_v28, %v665_v29 }
 0x18b   :  { %v678_v32 = vrot.slane %v670_v31, %v977_v30 }
 0x18d   :  { %v686_v34 = vcombine.low %v678_v32, %v685_v33 }
 0x18f   :  { %688 = vst [vmem:[%s988_s2] sm:$0xff] %v686_v34 }
 0x190   :  { %693 = vsyncpa [#allocation3], 1 }

</bundles_post_ra>
